<compile_context>
chip_gen: v7x
topology: tpu7x:2x2x1
jax: 0.10.0
libtpu: 0.0.40
codegen_flags: <defaults>
</compile_context>

<pallas_src>
import functools

import jax
import jax.numpy as jnp
from jax.experimental import pallas as pl
from jax.experimental.pallas import tpu as pltpu


def _round_up(x, m):
    return (x + m - 1) // m * m


def _vmem_capacity_bytes():
    try:
        return int(pltpu.get_tpu_info().vmem_capacity_bytes)
    except Exception:
        return 64 * 1024 * 1024  # conservative fallback: v7x has the smallest VMEM


def _pick_lane_tile(n_lanes, cin, cout, ltot, halo, out_itemsize, vmem_cap):
    """Largest multiple-of-128 divisor of n_lanes whose working set fits the VMEM budget."""
    budget = vmem_cap // 3
    x_bytes = 2 * cin * ltot * 2                    # resident bf16 input block, double-buffered
    cand = n_lanes
    while cand >= 128:
        if n_lanes % cand == 0:
            work = 2 * cout * cand * out_itemsize   # output block, double-buffered
            work += cout * cand * 4                 # f32 accumulator value
            work += 2 * cin * (cand + halo) * 2     # window value + one shifted tap (bf16)
            if x_bytes + work <= budget:
                return cand
        cand -= 128
    return 128


def _multiconv_kernel(x_ref, w_ref, b_ref, o_ref, *, tap_offsets, n_tile, halo, n_lane):
    # x_ref: (Cin, Ltot)         bf16  'same'-padded, per-image-flattened input (B fused in lanes)
    # w_ref: (KH*KW, Cout, Cin)  bf16  per-tap weight matrices
    # b_ref: (Cout, 1)           f32
    # o_ref: (Cout, n_tile)            output on the padded flat grid
    if n_lane == 1:
        window = x_ref[...]                                   # fully static path (demo shapes)
    else:
        # TODO(synk): multi-tile path uses a 128-aligned dynamic lane slice; the input block
        # stays fully resident across the lane-tile grid axis (same block index).
        base = pl.multiple_of(pl.program_id(1) * n_tile, 128)
        window = x_ref[:, pl.ds(base, n_tile + halo)]

    acc = None
    for idx, s in enumerate(tap_offsets):                     # static unroll over KH*KW taps
        xs = window[:, s:s + n_tile]                          # (Cin, n_tile) static lane shift
        part = jnp.dot(w_ref[idx], xs, preferred_element_type=jnp.float32)
        acc = part if acc is None else acc + part
    acc = acc + b_ref[...]                                    # (Cout, 1) broadcast over lanes
    o_ref[...] = acc.astype(o_ref.dtype)


@functools.partial(jax.jit, static_argnames=("padding", "strides"))
def multiconv2d(inputs, kernel, bias, padding="same", strides=1):
    """inputs: (T, B, Cin, H, W); kernel: (T, Cout, Cin, KH, KW); bias: (T, Cout).
    Returns a list of T arrays of shape (B, Cout, H, W), matching the torch module."""
    # TODO(synk): only the default padding='same', strides=1 path is implemented.
    assert padding == "same" and strides == 1

    T, B, Cin, H, W = inputs.shape
    _, Cout, _, KH, KW = kernel.shape
    out_dtype = inputs.dtype          # torch parity; switch to bf16 here if downstream allows

    ph_lo = (KH - 1) // 2
    ph_hi = (KH - 1) - ph_lo          # torch/XLA 'same': extra pad on the high side
    pw_lo = (KW - 1) // 2
    pw_hi = (KW - 1) - pw_lo
    H_pad, W_pad = H + KH - 1, W + KW - 1
    L = H_pad * W_pad                     # flattened padded image length
    L_img = _round_up(L, 128)             # per-image lane-dense length
    N = B * L_img                         # output lane extent per task (B fused in lanes)
    s_max = (KH - 1) * W_pad + (KW - 1)   # largest tap shift on the flat grid
    halo = _round_up(s_max, 128)
    Ltot = N + halo

    # ---- wrapper glue (one fused XLA copy): transpose, 'same' pad, flatten, cast -----
    x = inputs.transpose(0, 2, 1, 3, 4)                                       # (T,Cin,B,H,W)
    x = jnp.pad(x, ((0, 0), (0, 0), (0, 0), (ph_lo, ph_hi), (pw_lo, pw_hi)))  # (T,Cin,B,Hp,Wp)
    x = x.reshape(T, Cin, B, L)
    x = jnp.pad(x, ((0, 0), (0, 0), (0, 0), (0, L_img - L)))
    x = x.reshape(T, Cin, N)
    x = jnp.pad(x, ((0, 0), (0, 0), (0, halo)))                               # (T,Cin,Ltot)
    x = x.astype(jnp.bfloat16)            # halves the dominant HBM read; f32 acc in-kernel
    # TODO(synk): on v7x an fp8 cast (gated by a numerics check) would halve this read again.

    # Per-tap weight matrices: w4[t, i*KW + j] == kernel[t, :, :, i, j]  -> (Cout, Cin)
    w4 = kernel.transpose(0, 3, 4, 1, 2).reshape(T, KH * KW, Cout, Cin).astype(jnp.bfloat16)
    b3 = bias.reshape(T, Cout, 1).astype(jnp.float32)

    vmem_cap = _vmem_capacity_bytes()
    n_tile = _pick_lane_tile(N, Cin, Cout, Ltot, halo,
                             jnp.dtype(out_dtype).itemsize, vmem_cap)
    n_lane = N // n_tile
    vmem_limit = int(min(max(vmem_cap * 3 // 4, 32 * 1024 * 1024), 100 * 1024 * 1024))

    tap_offsets = tuple(i * W_pad + j for i in range(KH) for j in range(KW))
    kernel_fn = functools.partial(_multiconv_kernel, tap_offsets=tap_offsets,
                                  n_tile=n_tile, halo=halo, n_lane=n_lane)

    cost = pl.CostEstimate(
        flops=2 * T * Cout * Cin * KH * KW * N,
        transcendentals=0,
        bytes_accessed=(x.size * 2 + w4.size * 2 + b3.size * 4
                        + T * Cout * N * jnp.dtype(out_dtype).itemsize))

    # NOTE(v7x megacore): total parallel steps = T * n_lane; with odd T and n_lane == 1
    # one TensorCore gets one extra step (acceptable; T is data-dependent).
    out = pl.pallas_call(
        kernel_fn,
        out_shape=jax.ShapeDtypeStruct((T, Cout, N), out_dtype),
        grid_spec=pltpu.PrefetchScalarGridSpec(
            num_scalar_prefetch=0,
            grid=(T, n_lane),
            in_specs=[
                # Full padded-flat input per task; resident across the lane-tile axis.
                pl.BlockSpec((pl.Squeezed(), Cin, Ltot), lambda t, s: (t, 0, 0)),
                pl.BlockSpec((pl.Squeezed(), KH * KW, Cout, Cin), lambda t, s: (t, 0, 0, 0)),
                pl.BlockSpec((pl.Squeezed(), Cout, 1), lambda t, s: (t, 0, 0)),
            ],
            out_specs=pl.BlockSpec((pl.Squeezed(), Cout, n_tile), lambda t, s: (t, 0, s)),
        ),
        compiler_params=pltpu.CompilerParams(
            dimension_semantics=("parallel", "parallel"),
            vmem_limit_bytes=vmem_limit,
        ),
        cost_estimate=cost,
    )(x, w4, b3)

    # Strip flat-grid padding: valid output pixel (h, w) of image b sits at lane
    # b*L_img + h*W_pad + w.  (Single fused XLA slice/transpose copy, ~1x output size.)
    out = out.reshape(T, Cout, B, L_img)[..., :H * W_pad]
    out = out.reshape(T, Cout, B, H, W_pad)[..., :W]
    out = out.transpose(0, 2, 1, 3, 4)                         # (T, B, Cout, H, W)
    return [out[t] for t in range(T)]


def _reference(inputs, kernel, bias):
    """Pure-JAX reference of the torch forward (per-task conv2d, 'same', stride 1)."""
    outs = []
    for t in range(inputs.shape[0]):
        y = jax.lax.conv_general_dilated(
            inputs[t], kernel[t], window_strides=(1, 1), padding="SAME",
            dimension_numbers=("NCHW", "OIHW", "NCHW"),
            precision=jax.lax.Precision.HIGHEST)
        outs.append(y + bias[t][None, :, None, None])
    return outs


if __name__ == "__main__":
    T, B, Cin, Cout, H, W, KH, KW = 3, 2, 4, 8, 16, 16, 3, 3

    key = jax.random.PRNGKey(0)
    k_x, k_w, k_b = jax.random.split(key, 3)
    inputs = jax.random.normal(k_x, (T, B, Cin, H, W), dtype=jnp.float32)
    kernel = jax.random.normal(k_w, (T, Cout, Cin, KH, KW), dtype=jnp.float32) * 0.1
    bias = jax.random.normal(k_b, (T, Cout), dtype=jnp.float32) * 0.1

    outs = multiconv2d(inputs, kernel, bias)
    outs = [jax.block_until_ready(o) for o in outs]

    # Reference 1: exact f32 conv (torch semantics) -> loose tolerance (bf16 MXU inputs).
    refs_f32 = _reference(inputs, kernel, bias)
    # Reference 2: same bf16-rounded operands, f32 accumulation -> tight tolerance.
    refs_bf16 = _reference(inputs.astype(jnp.bfloat16).astype(jnp.float32),
                           kernel.astype(jnp.bfloat16).astype(jnp.float32), bias)

    for o, r32, rbf in zip(outs, refs_f32, refs_bf16):
        assert o.shape == (B, Cout, H, W), o.shape
        assert jnp.allclose(o, rbf, atol=2e-3, rtol=2e-3), float(jnp.max(jnp.abs(o - rbf)))
        assert jnp.allclose(o, r32, atol=5e-2, rtol=5e-2), float(jnp.max(jnp.abs(o - r32)))

    print("KERNEL_OK")
</pallas_src>

<mosaic_0001>
module attributes {stable_mosaic.version = 11 : i64} {
  func.func @_multiconv_kernel(%arg0: i32, %arg1: i32, %arg2: memref<1x4x896xbf16, #tpu.memory_space<vmem>>, %arg3: memref<1x9x8x4xbf16, #tpu.memory_space<vmem>>, %arg4: memref<1x8x1xf32, #tpu.memory_space<vmem>>, %arg5: memref<1x8x768xf32, #tpu.memory_space<vmem>>) attributes {dimension_semantics = [#tpu.dimension_semantics<parallel>, #tpu.dimension_semantics<parallel>], iteration_bounds = array<i64: 3, 1>, scalar_prefetch = 0 : i64, scratch_operands = 0 : i64, tpu.core_type = #tpu.core_type<tc>, window_params = [{transform_indices = @transform_0, window_bounds = array<i64: 1, 4, 896>}, {transform_indices = @transform_1, window_bounds = array<i64: 1, 9, 8, 4>}, {transform_indices = @transform_2, window_bounds = array<i64: 1, 8, 1>}, {transform_indices = @transform_3, window_bounds = array<i64: 1, 8, 768>}]} {
    %c0 = arith.constant 0 : index
    %c0_0 = arith.constant 0 : index
    %c0_1 = arith.constant 0 : index
    %0 = vector.load %arg2[%c0, %c0_0, %c0_1] : memref<1x4x896xbf16, #tpu.memory_space<vmem>>, vector<1x4x896xbf16>
    %1 = vector.shape_cast %0 : vector<1x4x896xbf16> to vector<4x896xbf16>
    %2 = vector.extract_strided_slice %1 {offsets = [0, 0], sizes = [4, 768], strides = [1, 1]} : vector<4x896xbf16> to vector<4x768xbf16>
    %c0_2 = arith.constant 0 : index
    %c0_3 = arith.constant 0 : index
    %c0_4 = arith.constant 0 : index
    %c0_5 = arith.constant 0 : index
    %3 = vector.load %arg3[%c0_2, %c0_3, %c0_4, %c0_5] : memref<1x9x8x4xbf16, #tpu.memory_space<vmem>>, vector<1x1x8x4xbf16>
    %4 = vector.shape_cast %3 : vector<1x1x8x4xbf16> to vector<8x4xbf16>
    %cst = arith.constant dense<0.000000e+00> : vector<8x768xf32>
    %5 = tpu.matmul %4, %2, %cst {dimension_numbers = #tpu.dot_dimension_numbers<[1], [0], [0], [1], [0, 0, 1, 1], [], []>} : vector<8x4xbf16>, vector<4x768xbf16>, vector<8x768xf32> -> vector<8x768xf32>
    %6 = vector.extract_strided_slice %1 {offsets = [0, 1], sizes = [4, 768], strides = [1, 1]} : vector<4x896xbf16> to vector<4x768xbf16>
    %c0_6 = arith.constant 0 : index
    %c1 = arith.constant 1 : index
    %c0_7 = arith.constant 0 : index
    %c0_8 = arith.constant 0 : index
    %7 = vector.load %arg3[%c0_6, %c1, %c0_7, %c0_8] : memref<1x9x8x4xbf16, #tpu.memory_space<vmem>>, vector<1x1x8x4xbf16>
    %8 = vector.shape_cast %7 : vector<1x1x8x4xbf16> to vector<8x4xbf16>
    %cst_9 = arith.constant dense<0.000000e+00> : vector<8x768xf32>
    %9 = tpu.matmul %8, %6, %cst_9 {dimension_numbers = #tpu.dot_dimension_numbers<[1], [0], [0], [1], [0, 0, 1, 1], [], []>} : vector<8x4xbf16>, vector<4x768xbf16>, vector<8x768xf32> -> vector<8x768xf32>
    %10 = arith.addf %5, %9 : vector<8x768xf32>
    %11 = vector.extract_strided_slice %1 {offsets = [0, 2], sizes = [4, 768], strides = [1, 1]} : vector<4x896xbf16> to vector<4x768xbf16>
    %c0_10 = arith.constant 0 : index
    %c2 = arith.constant 2 : index
    %c0_11 = arith.constant 0 : index
    %c0_12 = arith.constant 0 : index
    %12 = vector.load %arg3[%c0_10, %c2, %c0_11, %c0_12] : memref<1x9x8x4xbf16, #tpu.memory_space<vmem>>, vector<1x1x8x4xbf16>
    %13 = vector.shape_cast %12 : vector<1x1x8x4xbf16> to vector<8x4xbf16>
    %cst_13 = arith.constant dense<0.000000e+00> : vector<8x768xf32>
    %14 = tpu.matmul %13, %11, %cst_13 {dimension_numbers = #tpu.dot_dimension_numbers<[1], [0], [0], [1], [0, 0, 1, 1], [], []>} : vector<8x4xbf16>, vector<4x768xbf16>, vector<8x768xf32> -> vector<8x768xf32>
    %15 = arith.addf %10, %14 : vector<8x768xf32>
    %16 = vector.extract_strided_slice %1 {offsets = [0, 18], sizes = [4, 768], strides = [1, 1]} : vector<4x896xbf16> to vector<4x768xbf16>
    %c0_14 = arith.constant 0 : index
    %c3 = arith.constant 3 : index
    %c0_15 = arith.constant 0 : index
    %c0_16 = arith.constant 0 : index
    %17 = vector.load %arg3[%c0_14, %c3, %c0_15, %c0_16] : memref<1x9x8x4xbf16, #tpu.memory_space<vmem>>, vector<1x1x8x4xbf16>
    %18 = vector.shape_cast %17 : vector<1x1x8x4xbf16> to vector<8x4xbf16>
    %cst_17 = arith.constant dense<0.000000e+00> : vector<8x768xf32>
    %19 = tpu.matmul %18, %16, %cst_17 {dimension_numbers = #tpu.dot_dimension_numbers<[1], [0], [0], [1], [0, 0, 1, 1], [], []>} : vector<8x4xbf16>, vector<4x768xbf16>, vector<8x768xf32> -> vector<8x768xf32>
    %20 = arith.addf %15, %19 : vector<8x768xf32>
    %21 = vector.extract_strided_slice %1 {offsets = [0, 19], sizes = [4, 768], strides = [1, 1]} : vector<4x896xbf16> to vector<4x768xbf16>
    %c0_18 = arith.constant 0 : index
    %c4 = arith.constant 4 : index
    %c0_19 = arith.constant 0 : index
    %c0_20 = arith.constant 0 : index
    %22 = vector.load %arg3[%c0_18, %c4, %c0_19, %c0_20] : memref<1x9x8x4xbf16, #tpu.memory_space<vmem>>, vector<1x1x8x4xbf16>
    %23 = vector.shape_cast %22 : vector<1x1x8x4xbf16> to vector<8x4xbf16>
    %cst_21 = arith.constant dense<0.000000e+00> : vector<8x768xf32>
    %24 = tpu.matmul %23, %21, %cst_21 {dimension_numbers = #tpu.dot_dimension_numbers<[1], [0], [0], [1], [0, 0, 1, 1], [], []>} : vector<8x4xbf16>, vector<4x768xbf16>, vector<8x768xf32> -> vector<8x768xf32>
    %25 = arith.addf %20, %24 : vector<8x768xf32>
    %26 = vector.extract_strided_slice %1 {offsets = [0, 20], sizes = [4, 768], strides = [1, 1]} : vector<4x896xbf16> to vector<4x768xbf16>
    %c0_22 = arith.constant 0 : index
    %c5 = arith.constant 5 : index
    %c0_23 = arith.constant 0 : index
    %c0_24 = arith.constant 0 : index
    %27 = vector.load %arg3[%c0_22, %c5, %c0_23, %c0_24] : memref<1x9x8x4xbf16, #tpu.memory_space<vmem>>, vector<1x1x8x4xbf16>
    %28 = vector.shape_cast %27 : vector<1x1x8x4xbf16> to vector<8x4xbf16>
    %cst_25 = arith.constant dense<0.000000e+00> : vector<8x768xf32>
    %29 = tpu.matmul %28, %26, %cst_25 {dimension_numbers = #tpu.dot_dimension_numbers<[1], [0], [0], [1], [0, 0, 1, 1], [], []>} : vector<8x4xbf16>, vector<4x768xbf16>, vector<8x768xf32> -> vector<8x768xf32>
    %30 = arith.addf %25, %29 : vector<8x768xf32>
    %31 = vector.extract_strided_slice %1 {offsets = [0, 36], sizes = [4, 768], strides = [1, 1]} : vector<4x896xbf16> to vector<4x768xbf16>
    %c0_26 = arith.constant 0 : index
    %c6 = arith.constant 6 : index
    %c0_27 = arith.constant 0 : index
    %c0_28 = arith.constant 0 : index
    %32 = vector.load %arg3[%c0_26, %c6, %c0_27, %c0_28] : memref<1x9x8x4xbf16, #tpu.memory_space<vmem>>, vector<1x1x8x4xbf16>
    %33 = vector.shape_cast %32 : vector<1x1x8x4xbf16> to vector<8x4xbf16>
    %cst_29 = arith.constant dense<0.000000e+00> : vector<8x768xf32>
    %34 = tpu.matmul %33, %31, %cst_29 {dimension_numbers = #tpu.dot_dimension_numbers<[1], [0], [0], [1], [0, 0, 1, 1], [], []>} : vector<8x4xbf16>, vector<4x768xbf16>, vector<8x768xf32> -> vector<8x768xf32>
    %35 = arith.addf %30, %34 : vector<8x768xf32>
    %36 = vector.extract_strided_slice %1 {offsets = [0, 37], sizes = [4, 768], strides = [1, 1]} : vector<4x896xbf16> to vector<4x768xbf16>
    %c0_30 = arith.constant 0 : index
    %c7 = arith.constant 7 : index
    %c0_31 = arith.constant 0 : index
    %c0_32 = arith.constant 0 : index
    %37 = vector.load %arg3[%c0_30, %c7, %c0_31, %c0_32] : memref<1x9x8x4xbf16, #tpu.memory_space<vmem>>, vector<1x1x8x4xbf16>
    %38 = vector.shape_cast %37 : vector<1x1x8x4xbf16> to vector<8x4xbf16>
    %cst_33 = arith.constant dense<0.000000e+00> : vector<8x768xf32>
    %39 = tpu.matmul %38, %36, %cst_33 {dimension_numbers = #tpu.dot_dimension_numbers<[1], [0], [0], [1], [0, 0, 1, 1], [], []>} : vector<8x4xbf16>, vector<4x768xbf16>, vector<8x768xf32> -> vector<8x768xf32>
    %40 = arith.addf %35, %39 : vector<8x768xf32>
    %41 = vector.extract_strided_slice %1 {offsets = [0, 38], sizes = [4, 768], strides = [1, 1]} : vector<4x896xbf16> to vector<4x768xbf16>
    %c0_34 = arith.constant 0 : index
    %c8 = arith.constant 8 : index
    %c0_35 = arith.constant 0 : index
    %c0_36 = arith.constant 0 : index
    %42 = vector.load %arg3[%c0_34, %c8, %c0_35, %c0_36] : memref<1x9x8x4xbf16, #tpu.memory_space<vmem>>, vector<1x1x8x4xbf16>
    %43 = vector.shape_cast %42 : vector<1x1x8x4xbf16> to vector<8x4xbf16>
    %cst_37 = arith.constant dense<0.000000e+00> : vector<8x768xf32>
    %44 = tpu.matmul %43, %41, %cst_37 {dimension_numbers = #tpu.dot_dimension_numbers<[1], [0], [0], [1], [0, 0, 1, 1], [], []>} : vector<8x4xbf16>, vector<4x768xbf16>, vector<8x768xf32> -> vector<8x768xf32>
    %45 = arith.addf %40, %44 : vector<8x768xf32>
    %c0_38 = arith.constant 0 : index
    %c0_39 = arith.constant 0 : index
    %c0_40 = arith.constant 0 : index
    %46 = vector.load %arg4[%c0_38, %c0_39, %c0_40] : memref<1x8x1xf32, #tpu.memory_space<vmem>>, vector<1x8x1xf32>
    %47 = vector.shape_cast %46 : vector<1x8x1xf32> to vector<8x1xf32>
    %48 = vector.broadcast %47 : vector<8x1xf32> to vector<8x768xf32>
    %49 = arith.addf %45, %48 : vector<8x768xf32>
    %c0_41 = arith.constant 0 : index
    %c0_42 = arith.constant 0 : index
    %c0_43 = arith.constant 0 : index
    %50 = vector.load %arg5[%c0_41, %c0_42, %c0_43] : memref<1x8x768xf32, #tpu.memory_space<vmem>>, vector<1x8x768xf32>
    %51 = vector.shape_cast %50 : vector<1x8x768xf32> to vector<8x768xf32>
    %52 = vector.shape_cast %49 : vector<8x768xf32> to vector<1x8x768xf32>
    tpu.vector_store %arg5[%c0_41, %c0_42, %c0_43], %52 {strides = array<i32>} : memref<1x8x768xf32, #tpu.memory_space<vmem>>, vector<1x8x768xf32>,
    return
  }
  func.func @transform_0(%arg0: i32, %arg1: i32) -> (i32, i32, i32) {
    %c0_i32 = arith.constant 0 : i32
    %c0_i32_0 = arith.constant 0 : i32
    %c0_i32_1 = arith.constant 0 : i32
    return %arg0, %c0_i32, %c0_i32_0 : i32, i32, i32
  }
  func.func @transform_1(%arg0: i32, %arg1: i32) -> (i32, i32, i32, i32) {
    %c0_i32 = arith.constant 0 : i32
    %c0_i32_0 = arith.constant 0 : i32
    %c0_i32_1 = arith.constant 0 : i32
    %c0_i32_2 = arith.constant 0 : i32
    return %arg0, %c0_i32, %c0_i32_0, %c0_i32_1 : i32, i32, i32, i32
  }
  func.func @transform_2(%arg0: i32, %arg1: i32) -> (i32, i32, i32) {
    %c0_i32 = arith.constant 0 : i32
    %c0_i32_0 = arith.constant 0 : i32
    %c0_i32_1 = arith.constant 0 : i32
    return %arg0, %c0_i32, %c0_i32_0 : i32, i32, i32
  }
  func.func @transform_3(%arg0: i32, %arg1: i32) -> (i32, i32, i32) {
    %c0_i32 = arith.constant 0 : i32
    %c0_i32_0 = arith.constant 0 : i32
    return %arg0, %c0_i32, %arg1 : i32, i32, i32
  }
}

</mosaic_0001>

<bundles_post_ra>
// kernel: multiconv2d.1
= control target key start
LH: loop header
LB: loop body
LE: loop exit
PB: predicated region body
PF: predicated region fallthrough
CT: control target
= control target key end

     0   :  { %s2084_s12 = smov 0   ;;  %s2086_s13 = smov 0   ;;  %s2369_s0 = inlined_call_operand.vmem [shape: bf16[3,4,896], index: 0, kind: input, shape index: {}]   ;;  %s2370_s1 = inlined_call_operand.vmem [shape: bf16[3,9,8,4], index: 1, kind: input, shape index: {}]   ;;  %s2371_s2 = inlined_call_operand.vmem [shape: f32[3,8,1], index: 2, kind: input, shape index: {}]   ;;  %s2372_s3 = inlined_call_operand.vmem [shape: f32[3,8,768], index: 3, kind: output, shape index: {}]  }
   0x1   :  { %s2088_s14 = smov 0  }
   0x2 LB: > { %s25_s15 = sadd.s32 1, %s2048_s13  ;;  %p1921_p0 = scmp.ge.s32.totalorder %s2052_s14, 1  ;;  %s2052_s14 = sphi %s2088_s14, %s13_s14   ;;  %s2048_s13 = sphi %s2086_s13, %s2374_s13   ;;  %s2044_s12 = sphi %s2084_s12, %s2373_s12  }
   0x3   : > { %p27_p1 = scmp.ge.s32.totalorder %s25_s15, 3  ;;  %p170_p2 = scmp.lt.s32.totalorder %s2052_s14, 4 }
   0x5   : > { %s2376_s15 = smov (%p27_p1, %s25_s15), 0  ;;  %p171_p3 = pnand %p1921_p0, %p170_p2 }
   0x6   : > { %p207_p4 = scmp.lt.s32.totalorder (!%p171_p3), %s2044_s12, 2  ;;  %v243_v0 = vlaneseq (!%p171_p3)  ;;  %v2054_v1 = vmov (!%p171_p3), 1983009808   ;;  %v2055_v6 = vmov (!%p171_p3), 0   ;;  %s2056_s20 = smov (!%p171_p3), 126   ;;  %vm286_vm0 = vcmask (!%p171_p3), 1039360  }
   0x7   : > { %174 = sbr.rel (%p171_p3) target bundleno = 467 (0x1d3), region = 32  ;;  %v241_v2 = vunpack.c.l.s4 (!%p171_p3), %v2054_v1  ;;  %348 = vmatprep.mubr.bf16.mxu0 (!%p171_p3), %v2055_v6  ;;  %389 = vmatprep.mubr.bf16.mxu1 (!%p171_p3), %v2055_v6  ;;  %s2057_s21 = smov (!%p171_p3), 127   ;;  %vm297_vm1 = vcmask (!%p171_p3), 1041408   ;;  %vm293_vm2 = vcmask (!%p171_p3), 31744   ;;  %vm599_vm3 = vcmask (!%p171_p3), 1031168  }
   0x8   : > { %v244_v3 = vshrl.u32 (!%p171_p3), %v243_v0, 7  ;;  %2027 = vset.pattern.permute.xlu0 (!%p171_p3), %v2055_v6  ;;  %s2058_s22 = smov (!%p171_p3), 110   ;;  %s2059_s23 = smov (!%p171_p3), 109   ;;  %vm772_vm4 = vcmask (!%p171_p3), 900096   ;;  %vm945_vm5 = vcmask (!%p171_p3), 891904   ;;  %vm1118_vm6 = vcmask (!%p171_p3), 883712  }
   0x9   : > { %v242_v4 = vunpack.c.0.s8 (!%p171_p3), %v241_v2  ;;  %s2060_s24 = smov (!%p171_p3), 108   ;;  %s2061_s25 = smov (!%p171_p3), 92   ;;  %vm1291_vm7 = vcmask (!%p171_p3), 752640   ;;  %vm1464_vm8 = vcmask (!%p171_p3), 744448   ;;  %vm1637_vm9 = vcmask (!%p171_p3), 736256  }
   0xa   : > { %s2062_s26 = smov (!%p171_p3), 91   ;;  %s2063_s27 = smov (!%p171_p3), 90  }
   0xb   : > { %v245_v5 = vsub.s32 (!%p171_p3), %v242_v4, %v244_v3 }
   0xe   : > { %s2378_s12 = smov (!%p207_p4, %s2044_s12), 2 }
   0xf   : > { %s1990_s16 = smul.u32 14, %s2378_s12  ;;  %s1924_s28 = sshll.u32 %s2378_s12, 3 }
  0x10   : > { %s220_s4 = scalar_lea.vmem %s2371_s2, %s1924_s28  ;;  %s1991_s5 = smul.u32 36, %s2378_s12 }
  0x11   : > { %s211_s19 = scalar_lea.vmem %s2369_s0, %s1990_s16  ;;  %v1794_v18 = vld [vmem:[%s220_s4] sm:$0xff]  ;;  %s1992_s9 = smul.u32 48, %s2378_s12 }
  0x12   : > { %v232_v7 = vld [vmem:[%s211_s19] sm:$0xff]  ;;  %v233_v8 = vld [vmem:[%s211_s19 + $0x8] sm:$0x3f]  ;;  %s2185_s8 = scalar_lea.vmem %s2370_s1, %s1991_s5 }
  0x13   : > { %v2111_v9 = vrot.slane %v232_v7, %v245_v5  ;;  %v239_v10 = vcombine.high %v232_v7, %v232_v7  ;;  %v2121_v13 = vrot.slane %v233_v8, %v245_v5  ;;  %v256_v15 = vcombine.high %v233_v8, %v233_v8  ;;  %v1926_v26 = vld [vmem:[%s2185_s8 + $0x4] sm:$0xf]  ;;  %v234_v45 = vld [vmem:[%s2185_s8] sm:$0xf]  ;;  %v1939_v56 = vld [vmem:[%s2185_s8 + $0x8] sm:$0xf]  ;;  %s229_s16 = scalar_lea.vmem %s2372_s3, %s1992_s9 }
  0x15   : > { %585 = vrot.lane.b32.xlu1 %v2111_v9, %s2056_s20  ;;  %272 = vrot.lane.b32.xlu0 %v2111_v9, %s2057_s21  ;;  %v2117_v11 = vcombine.high %v2111_v9, %v2111_v9  ;;  %v2119_v12 = vrot.slane %v239_v10, %v245_v5  ;;  %v2127_v14 = vcombine.high %v2121_v13, %v2121_v13  ;;  %v443_v40 = vsel %vm297_vm1, %v2111_v9, 0 }
  0x16   : > { %v270_v16 = vrot.slane %v256_v15, %v245_v5  ;;  %v455_v48 = vsel %vm297_vm1, %v2121_v13, 0 }
  0x17   : > { %v2133_v17 = vcombine.high %v2119_v12, %v2119_v12  ;;  %v449_v39 = vsel %vm297_vm1, %v2119_v12, 0 }
  0x19   : > { %274 = vrot.lane.b32.xlu0 %v2117_v11, %s2057_s21  ;;  %276 = vrot.lane.b32.xlu1 %v2119_v12, %s2057_s21 }
  0x1d   : > { %280 = vrot.lane.b32.xlu0 %v2121_v13, %s2057_s21  ;;  %282 = vrot.lane.b32.xlu1 %v2127_v14, %s2057_s21 }
  0x21   : > { %284 = vrot.lane.b32.xlu0 %v270_v16, %s2057_s21  ;;  %278 = vrot.lane.b32.xlu1 %v2133_v17, %s2057_s21 }
  0x25   : > { %587 = vrot.lane.b32.xlu0 %v2117_v11, %s2056_s20  ;;  %589 = vrot.lane.b32.xlu1 %v2119_v12, %s2056_s20 }
  0x29   : > { %591 = vrot.lane.b32.xlu0 %v2133_v17, %s2056_s20  ;;  %593 = vrot.lane.b32.xlu1 %v2121_v13, %s2056_s20 }
  0x2d   : > { %595 = vrot.lane.b32.xlu0 %v2127_v14, %s2056_s20  ;;  %597 = vrot.lane.b32.xlu1 %v270_v16, %s2056_s20 }
  0x31   : > { %758 = vrot.lane.b32.xlu0 %v2111_v9, %s2058_s22  ;;  %760 = vrot.lane.b32.xlu1 %v2117_v11, %s2058_s22 }
  0x35   : > { %762 = vrot.lane.b32.xlu0 %v2119_v12, %s2058_s22  ;;  %764 = vrot.lane.b32.xlu1 %v2133_v17, %s2058_s22 }
  0x39   : > { %766 = vrot.lane.b32.xlu0 %v2121_v13, %s2058_s22  ;;  %768 = vrot.lane.b32.xlu1 %v2127_v14, %s2058_s22 }
  0x3d   : > { %770 = vrot.lane.b32.xlu0 %v270_v16, %s2058_s22  ;;  %931 = vrot.lane.b32.xlu1 %v2111_v9, %s2059_s23 }
  0x41   : > { %933 = vrot.lane.b32.xlu0 %v2117_v11, %s2059_s23  ;;  %935 = vrot.lane.b32.xlu1 %v2119_v12, %s2059_s23 }
  0x45   : > { %937 = vrot.lane.b32.xlu0 %v2133_v17, %s2059_s23  ;;  %939 = vrot.lane.b32.xlu1 %v2121_v13, %s2059_s23 }
  0x49   : > { %941 = vrot.lane.b32.xlu0 %v2127_v14, %s2059_s23  ;;  %943 = vrot.lane.b32.xlu1 %v270_v16, %s2059_s23 }
  0x4d   : > { %1104 = vrot.lane.b32.xlu0 %v2111_v9, %s2060_s24  ;;  %1106 = vrot.lane.b32.xlu1 %v2117_v11, %s2060_s24 }
  0x51   : > { %1108 = vrot.lane.b32.xlu0 %v2119_v12, %s2060_s24  ;;  %1110 = vrot.lane.b32.xlu1 %v2133_v17, %s2060_s24 }
  0x55   : > { %1112 = vrot.lane.b32.xlu0 %v2121_v13, %s2060_s24  ;;  %1114 = vrot.lane.b32.xlu1 %v2127_v14, %s2060_s24 }
  0x59   : > { %1116 = vrot.lane.b32.xlu0 %v270_v16, %s2060_s24  ;;  %1277 = vrot.lane.b32.xlu1 %v2111_v9, %s2061_s25 }
  0x5d   : > { %1279 = vrot.lane.b32.xlu0 %v2117_v11, %s2061_s25  ;;  %1281 = vrot.lane.b32.xlu1 %v2119_v12, %s2061_s25 }
  0x61   : > { %1283 = vrot.lane.b32.xlu0 %v2133_v17, %s2061_s25  ;;  %1285 = vrot.lane.b32.xlu1 %v2121_v13, %s2061_s25 }
  0x65   : > { %1287 = vrot.lane.b32.xlu0 %v2127_v14, %s2061_s25  ;;  %1289 = vrot.lane.b32.xlu1 %v270_v16, %s2061_s25 }
  0x69   : > { %1450 = vrot.lane.b32.xlu0 %v2111_v9, %s2062_s26  ;;  %1452 = vrot.lane.b32.xlu1 %v2117_v11, %s2062_s26 }
  0x6d   : > { %1454 = vrot.lane.b32.xlu0 %v2119_v12, %s2062_s26  ;;  %1456 = vrot.lane.b32.xlu1 %v2133_v17, %s2062_s26 }
  0x71   : > { %1458 = vrot.lane.b32.xlu0 %v2121_v13, %s2062_s26  ;;  %1460 = vrot.lane.b32.xlu1 %v2127_v14, %s2062_s26 }
  0x75   : > { %1462 = vrot.lane.b32.xlu0 %v270_v16, %s2062_s26  ;;  %1623 = vrot.lane.b32.xlu1 %v2111_v9, %s2063_s27 }
  0x79   : > { %1625 = vrot.lane.b32.xlu0 %v2117_v11, %s2063_s27  ;;  %1627 = vrot.lane.b32.xlu1 %v2119_v12, %s2063_s27 }
  0x7d   : > { %1629 = vrot.lane.b32.xlu0 %v2133_v17, %s2063_s27  ;;  %1631 = vrot.lane.b32.xlu1 %v2121_v13, %s2063_s27 }
  0x81   : > { %1633 = vrot.lane.b32.xlu0 %v2127_v14, %s2063_s27  ;;  %1635 = vrot.lane.b32.xlu1 %v270_v16, %s2063_s27 }
  0x85   : > { %1797 = vperm.xlu0 %2027, %v1794_v18  }
  0x87   : > { %v586_v19 = vpop.permute.xlu1 %585  ;;  %v273_v20 = vpop.permute.xlu0 %272 }
  0x8b   : > { %v275_v21 = vpop.permute.xlu0 %274  ;;  %v277_v22 = vpop.permute.xlu1 %276 }
  0x8c   : > { %v288_v23 = vsel %vm286_vm0, %v275_v21, %v277_v22  ;;  %v287_v24 = vsel %vm286_vm0, %v273_v20, %v275_v21 }
  0x8d   : > { %1927 = vmatprep.subr.msk.bf16.mxu0 %vm297_vm1, %v288_v23  ;;  %v299_v25 = vsel %vm297_vm1, %v287_v24, 0 }
  0x8e   : > { %317 = vmatpush1.bf16.msra.mxu0 %v299_v25  ;;  %v1953_v25 = vld [vmem:[%s2185_s8 + $0x10] sm:$0xf] }
  0x8f   : > { %v281_v27 = vpop.permute.xlu0 %280  ;;  %v283_v28 = vpop.permute.xlu1 %282 }
  0x90   : > { %v291_v29 = vsel %vm286_vm0, %v281_v27, %v283_v28 }
  0x91   : > { %1928 = vmatmul.mubr.msk.bf16.vlgmr.msra.gmra.mrb[0].mxu0 %vm293_vm2, %v1926_v26  ;;  %v311_v35 = vsel %vm297_vm1, %v291_v29, 0 }
  0x92   : > { %430 = vmatprep.mubr.bf16.mxu0 %v2055_v6 }
  0x93   : > { %v285_v30 = vpop.permute.xlu0 %284  ;;  %v279_v31 = vpop.permute.xlu1 %278 }
  0x94   : > { %v292_v32 = vsel %vm286_vm0, %v283_v28, %v285_v30  ;;  %v290_v33 = vsel %vm286_vm0, %v279_v31, %v281_v27  ;;  %v289_v34 = vsel %vm286_vm0, %v277_v22, %v279_v31 }
  0x95   : > { %1929 = vmatprep.subr.msk.bf16.mxu1 %vm297_vm1, %v290_v33  ;;  %1931 = vmatprep.subr.msk.bf16.mxu0 %vm297_vm1, %v292_v32  ;;  %v305_v36 = vsel %vm297_vm1, %v289_v34, 0 }
  0x96   : > { %358 = vmatpush1.bf16.msra.mxu1 %v305_v36  ;;  %399 = vmatpush1.bf16.msra.mxu0 %v311_v35 }
  0x97   : > { %v588_v37 = vpop.permute.xlu0 %587  ;;  %v590_v38 = vpop.permute.xlu1 %589  ;;  %1935 = vmatprep.subr.msk.bf16.mxu0 %vm297_vm1, %v2133_v17  ;;  %1933 = vmatprep.subr.msk.bf16.mxu1 %vm297_vm1, %v2117_v11 }
  0x98   : > { %v601_v41 = vsel %vm599_vm3, %v588_v37, %v590_v38  ;;  %v600_v44 = vsel %vm599_vm3, %v586_v19, %v588_v37 }
  0x99   : > { %1930 = vmatmul.mubr.msk.bf16.vlgmr.msra.gmra.mrb[0].mxu1 %vm293_vm2, %v1926_v26  ;;  %1932 = vmatmul.mubr.msk.bf16.vlgmr.msra.gmra.mrb[4].mxu0 %vm293_vm2, %v1926_v26  ;;  %v610_v50 = vsel %vm297_vm1, %v600_v44, 0  ;;  %v1960_v44 = vld [vmem:[%s2185_s8 + $0x14] sm:$0xf] }
  0x9a   : > { %502 = vmatpush1.bf16.msra.mxu0 %v449_v39  ;;  %461 = vmatpush1.bf16.msra.mxu1 %v443_v40 }
  0x9b   : > { %v592_v42 = vpop.permute.xlu0 %591  ;;  %v594_v43 = vpop.permute.xlu1 %593  ;;  %1940 = vmatprep.subr.msk.bf16.mxu0 %vm297_vm1, %v601_v41  ;;  %492 = vmatprep.mubr.bf16.mxu1 %v2055_v6 }
  0x9c   : > { %533 = vmatprep.mubr.bf16.mxu0 %v2055_v6  ;;  %1937 = vmatprep.subr.msk.bf16.mxu1 %vm297_vm1, %v2127_v14  ;;  %v603_v51 = vsel %vm599_vm3, %v592_v42, %v594_v43  ;;  %v602_v54 = vsel %vm599_vm3, %v590_v38, %v592_v42  ;;  %v1946_v14 = vld [vmem:[%s2185_s8 + $0xc] sm:$0xf] }
  0x9d   : > { %v616_v60 = vsel %vm297_vm1, %v602_v54, 0 }
  0x9f   : > { %v596_v46 = vpop.permute.xlu0 %595  ;;  %v598_v47 = vpop.permute.xlu1 %597 }
  0xa0   : > { %v605_v49 = vsel %vm599_vm3, %v596_v46, %v598_v47  ;;  %v604_v55 = vsel %vm599_vm3, %v594_v43, %v596_v46 }
  0xa1   : > { %1934 = vmatmul.mubr.msk.bf16.vlgmr.msra.gmra.mrb[4].mxu1 %vm293_vm2, %v234_v45  ;;  %1936 = vmatmul.mubr.msk.bf16.vlgmr.msra.gmra.mrb[8].mxu0 %vm293_vm2, %v234_v45  ;;  %v622_v61 = vsel %vm297_vm1, %v604_v55, 0  ;;  %v1967_v55 = vld [vmem:[%s2185_s8 + $0x18] sm:$0xf] }
  0xa2   : > { %543 = vmatpush1.bf16.msra.mxu1 %v455_v48  ;;  %628 = vmatpush1.bf16.msra.mxu0 %v610_v50 }
  0xa3   : > { %1942 = vmatprep.subr.msk.bf16.mxu1 %vm297_vm1, %v603_v51  ;;  %1944 = vmatprep.subr.msk.bf16.mxu0 %vm297_vm1, %v605_v49  ;;  %v759_v52 = vpop.permute.xlu0 %758  ;;  %v761_v53 = vpop.permute.xlu1 %760 }
  0xa4   : > { %574 = vmatprep.mubr.bf16.mxu1 %v2055_v6  ;;  %659 = vmatprep.mubr.bf16.mxu0 %v2055_v6  ;;  %v773_v1 = vsel %vm772_vm4, %v759_v52, %v761_v53 }
  0xa5   : > { %v783_v7 = vsel %vm297_vm1, %v773_v1, 0 }
  0xa7   : > { %v763_v57 = vpop.permute.xlu0 %762  ;;  %v765_v58 = vpop.permute.xlu1 %764 }
  0xa8   : > { %v774_v59 = vsel %vm772_vm4, %v761_v53, %v763_v57  ;;  %v775_v2 = vsel %vm772_vm4, %v763_v57, %v765_v58 }
  0xa9   : > { %1938 = vmatmul.mubr.msk.bf16.vlgmr.msra.gmra.mrb[8].mxu1 %vm293_vm2, %v234_v45  ;;  %1941 = vmatmul.mubr.msk.bf16.vlgmr.msra.gmra.mrb[12].mxu0 %vm293_vm2, %v1939_v56  ;;  %v789_v8 = vsel %vm297_vm1, %v775_v2, 0 }
  0xaa   : > { %669 = vmatpush1.bf16.msra.mxu1 %v616_v60  ;;  %710 = vmatpush1.bf16.msra.mxu0 %v622_v61 }
  0xab   : > { %1947 = vmatprep.subr.msk.bf16.mxu1 %vm297_vm1, %v774_v59  ;;  %v767_v62 = vpop.permute.xlu0 %766  ;;  %v769_v63 = vpop.permute.xlu1 %768  ;;  %700 = vmatprep.mubr.bf16.mxu1 %v2055_v6 }
  0xac   : > { %v776_v0 = vsel %vm772_vm4, %v765_v58, %v767_v62  ;;  %741 = vmatprep.mubr.bf16.mxu0 %v2055_v6  ;;  %v777_v12 = vsel %vm772_vm4, %v767_v62, %v769_v63 }
  0xad   : > { %1949 = vmatprep.subr.msk.bf16.mxu0 %vm297_vm1, %v776_v0  ;;  %v795_v18 = vsel %vm297_vm1, %v777_v12, 0 }
  0xaf   : > { %v771_v3 = vpop.permute.xlu0 %770  ;;  %v932_v4 = vpop.permute.xlu1 %931 }
  0xb0   : > { %v778_v5 = vsel %vm772_vm4, %v769_v63, %v771_v3 }
  0xb1   : > { %1943 = vmatmul.mubr.msk.bf16.vlgmr.msra.gmra.mrb[12].mxu1 %vm293_vm2, %v1939_v56  ;;  %1945 = vmatmul.mubr.msk.bf16.vlgmr.msra.gmra.mrb[16].mxu0 %vm293_vm2, %v1939_v56 }
  0xb2   : > { %801 = vmatpush1.bf16.msra.mxu1 %v783_v7  ;;  %842 = vmatpush1.bf16.msra.mxu0 %v789_v8 }
  0xb3   : > { %1951 = vmatprep.subr.msk.bf16.mxu1 %vm297_vm1, %v778_v5  ;;  %v934_v9 = vpop.permute.xlu0 %933  ;;  %v936_v10 = vpop.permute.xlu1 %935  ;;  %832 = vmatprep.mubr.bf16.mxu1 %v2055_v6 }
  0xb4   : > { %v947_v11 = vsel %vm945_vm5, %v934_v9, %v936_v10  ;;  %873 = vmatprep.mubr.bf16.mxu0 %v2055_v6  ;;  %v946_v13 = vsel %vm945_vm5, %v932_v4, %v934_v9 }
  0xb5   : > { %1954 = vmatprep.subr.msk.bf16.mxu0 %vm297_vm1, %v947_v11  ;;  %v956_v19 = vsel %vm297_vm1, %v946_v13, 0  ;;  %v1974_v11 = vld [vmem:[%s2185_s8 + $0x1c] sm:$0xf] }
  0xb7   : > { %v938_v15 = vpop.permute.xlu0 %937  ;;  %v940_v16 = vpop.permute.xlu1 %939 }
  0xb8   : > { %v949_v17 = vsel %vm945_vm5, %v938_v15, %v940_v16  ;;  %v948_v23 = vsel %vm945_vm5, %v936_v10, %v938_v15 }
  0xb9   : > { %1948 = vmatmul.mubr.msk.bf16.vlgmr.msra.gmra.mrb[16].mxu1 %vm293_vm2, %v1946_v14  ;;  %1950 = vmatmul.mubr.msk.bf16.vlgmr.msra.gmra.mrb[20].mxu0 %vm293_vm2, %v1946_v14  ;;  %v962_v28 = vsel %vm297_vm1, %v948_v23, 0 }
  0xba   : > { %883 = vmatpush1.bf16.msra.mxu1 %v795_v18  ;;  %974 = vmatpush1.bf16.msra.mxu0 %v956_v19 }
  0xbb   : > { %1956 = vmatprep.subr.msk.bf16.mxu1 %vm297_vm1, %v949_v17  ;;  %v942_v20 = vpop.permute.xlu0 %941  ;;  %v944_v21 = vpop.permute.xlu1 %943  ;;  %914 = vmatprep.mubr.bf16.mxu1 %v2055_v6 }
  0xbc   : > { %v951_v22 = vsel %vm945_vm5, %v942_v20, %v944_v21  ;;  %1005 = vmatprep.mubr.bf16.mxu0 %v2055_v6  ;;  %v950_v24 = vsel %vm945_vm5, %v940_v16, %v942_v20 }
  0xbd   : > { %1958 = vmatprep.subr.msk.bf16.mxu0 %vm297_vm1, %v951_v22  ;;  %v968_v29 = vsel %vm297_vm1, %v950_v24, 0  ;;  %v1981_v22 = vld [vmem:[%s2185_s8 + $0x20] sm:$0xf] }
  0xbf   : > { %v1105_v26 = vpop.permute.xlu0 %1104  ;;  %v1107_v27 = vpop.permute.xlu1 %1106 }
  0xc0   : > { %v1119_v33 = vsel %vm1118_vm6, %v1105_v26, %v1107_v27 }
  0xc1   : > { %1952 = vmatmul.mubr.msk.bf16.vlgmr.msra.gmra.mrb[20].mxu1 %vm293_vm2, %v1946_v14  ;;  %1955 = vmatmul.mubr.msk.bf16.vlgmr.msra.gmra.mrb[24].mxu0 %vm293_vm2, %v1953_v25  ;;  %v1129_v38 = vsel %vm297_vm1, %v1119_v33, 0 }
  0xc2   : > { %1015 = vmatpush1.bf16.msra.mxu1 %v962_v28  ;;  %1056 = vmatpush1.bf16.msra.mxu0 %v968_v29 }
  0xc3   : > { %v1109_v30 = vpop.permute.xlu0 %1108  ;;  %v1111_v31 = vpop.permute.xlu1 %1110  ;;  %1046 = vmatprep.mubr.bf16.mxu1 %v2055_v6  ;;  %1087 = vmatprep.mubr.bf16.mxu0 %v2055_v6 }
  0xc4   : > { %v1120_v32 = vsel %vm1118_vm6, %v1107_v27, %v1109_v30  ;;  %v1121_v34 = vsel %vm1118_vm6, %v1109_v30, %v1111_v31 }
  0xc5   : > { %1961 = vmatprep.subr.msk.bf16.mxu1 %vm297_vm1, %v1120_v32  ;;  %v1135_v39 = vsel %vm297_vm1, %v1121_v34, 0 }
  0xc7   : > { %v1113_v35 = vpop.permute.xlu0 %1112  ;;  %v1115_v36 = vpop.permute.xlu1 %1114 }
  0xc8   : > { %v1122_v37 = vsel %vm1118_vm6, %v1111_v31, %v1113_v35  ;;  %v1123_v43 = vsel %vm1118_vm6, %v1113_v35, %v1115_v36 }
  0xc9   : > { %1957 = vmatmul.mubr.msk.bf16.vlgmr.msra.gmra.mrb[24].mxu1 %vm293_vm2, %v1953_v25  ;;  %1959 = vmatmul.mubr.msk.bf16.vlgmr.msra.gmra.mrb[28].mxu0 %vm293_vm2, %v1953_v25  ;;  %v1141_v49 = vsel %vm297_vm1, %v1123_v43, 0 }
  0xca   : > { %1147 = vmatpush1.bf16.msra.mxu1 %v1129_v38  ;;  %1963 = vmatprep.subr.msk.bf16.mxu0 %vm297_vm1, %v1122_v37 }
  0xcb   : > { %1188 = vmatpush1.bf16.msra.mxu0 %v1135_v39  ;;  %v1117_v40 = vpop.permute.xlu0 %1116  ;;  %v1278_v41 = vpop.permute.xlu1 %1277  ;;  %1178 = vmatprep.mubr.bf16.mxu1 %v2055_v6 }
  0xcc   : > { %v1124_v42 = vsel %vm1118_vm6, %v1115_v36, %v1117_v40  ;;  %1219 = vmatprep.mubr.bf16.mxu0 %v2055_v6 }
  0xcd   : > { %1965 = vmatprep.subr.msk.bf16.mxu1 %vm297_vm1, %v1124_v42 }
  0xcf   : > { %v1280_v45 = vpop.permute.xlu0 %1279  ;;  %v1282_v46 = vpop.permute.xlu1 %1281 }
  0xd0   : > { %v1292_v47 = vsel %vm1291_vm7, %v1278_v41, %v1280_v45  ;;  %v1293_v48 = vsel %vm1291_vm7, %v1280_v45, %v1282_v46 }
  0xd1   : > { %v1302_v50 = vsel %vm297_vm1, %v1292_v47, 0  ;;  %1962 = vmatmul.mubr.msk.bf16.vlgmr.msra.gmra.mrb[28].mxu1 %vm293_vm2, %v1960_v44  ;;  %1964 = vmatmul.mubr.msk.bf16.vlgmr.msra.gmra.mrb[32].mxu0 %vm293_vm2, %v1960_v44 }
  0xd2   : > { %1229 = vmatpush1.bf16.msra.mxu1 %v1141_v49  ;;  %1968 = vmatprep.subr.msk.bf16.mxu0 %vm297_vm1, %v1293_v48 }
  0xd3   : > { %1320 = vmatpush1.bf16.msra.mxu0 %v1302_v50  ;;  %v1284_v51 = vpop.permute.xlu0 %1283  ;;  %v1286_v52 = vpop.permute.xlu1 %1285  ;;  %1260 = vmatprep.mubr.bf16.mxu1 %v2055_v6 }
  0xd4   : > { %v1295_v53 = vsel %vm1291_vm7, %v1284_v51, %v1286_v52  ;;  %1351 = vmatprep.mubr.bf16.mxu0 %v2055_v6  ;;  %v1294_v54 = vsel %vm1291_vm7, %v1282_v46, %v1284_v51 }
  0xd5   : > { %1970 = vmatprep.subr.msk.bf16.mxu1 %vm297_vm1, %v1295_v53  ;;  %v1308_v60 = vsel %vm297_vm1, %v1294_v54, 0 }
  0xd7   : > { %v1288_v56 = vpop.permute.xlu0 %1287  ;;  %v1290_v57 = vpop.permute.xlu1 %1289 }
  0xd8   : > { %v1296_v58 = vsel %vm1291_vm7, %v1286_v52, %v1288_v56  ;;  %v1297_v59 = vsel %vm1291_vm7, %v1288_v56, %v1290_v57 }
  0xd9   : > { %v1314_v61 = vsel %vm297_vm1, %v1296_v58, 0  ;;  %1966 = vmatmul.mubr.msk.bf16.vlgmr.msra.gmra.mrb[32].mxu1 %vm293_vm2, %v1960_v44  ;;  %1969 = vmatmul.mubr.msk.bf16.vlgmr.msra.gmra.mrb[36].mxu0 %vm293_vm2, %v1967_v55 }
  0xda   : > { %1361 = vmatpush1.bf16.msra.mxu1 %v1308_v60  ;;  %1972 = vmatprep.subr.msk.bf16.mxu0 %vm297_vm1, %v1297_v59 }
  0xdb   : > { %1402 = vmatpush1.bf16.msra.mxu0 %v1314_v61  ;;  %v1451_v62 = vpop.permute.xlu0 %1450  ;;  %v1453_v63 = vpop.permute.xlu1 %1452  ;;  %1392 = vmatprep.mubr.bf16.mxu1 %v2055_v6 }
  0xdc   : > { %1433 = vmatprep.mubr.bf16.mxu0 %v2055_v6  ;;  %v1465_v0 = vsel %vm1464_vm8, %v1451_v62, %v1453_v63 }
  0xdd   : > { %v1475_v4 = vsel %vm297_vm1, %v1465_v0, 0 }
  0xdf   : > { %v1455_v1 = vpop.permute.xlu0 %1454  ;;  %v1457_v2 = vpop.permute.xlu1 %1456 }
  0xe0   : > { %v1466_v3 = vsel %vm1464_vm8, %v1453_v63, %v1455_v1  ;;  %v1467_v5 = vsel %vm1464_vm8, %v1455_v1, %v1457_v2 }
  0xe1   : > { %1971 = vmatmul.mubr.msk.bf16.vlgmr.msra.gmra.mrb[36].mxu1 %vm293_vm2, %v1967_v55  ;;  %1973 = vmatmul.mubr.msk.bf16.vlgmr.msra.gmra.mrb[40].mxu0 %vm293_vm2, %v1967_v55  ;;  %v1481_v10 = vsel %vm297_vm1, %v1467_v5, 0 }
  0xe2   : > { %1975 = vmatprep.subr.msk.bf16.mxu1 %vm297_vm1, %v1466_v3  ;;  %1524 = vmatprep.mubr.bf16.mxu1 %v2055_v6 }
  0xe3   : > { %1493 = vmatpush1.bf16.msra.mxu1 %v1475_v4  ;;  %v1459_v7 = vpop.permute.xlu0 %1458  ;;  %v1461_v8 = vpop.permute.xlu1 %1460  ;;  %1565 = vmatprep.mubr.bf16.mxu0 %v2055_v6 }
  0xe4   : > { %v1468_v9 = vsel %vm1464_vm8, %v1457_v2, %v1459_v7  ;;  %v1469_v12 = vsel %vm1464_vm8, %v1459_v7, %v1461_v8 }
  0xe5   : > { %1977 = vmatprep.subr.msk.bf16.mxu0 %vm297_vm1, %v1468_v9  ;;  %v1487_v16 = vsel %vm297_vm1, %v1469_v12, 0 }
  0xe6   : > { %1534 = vmatpush1.bf16.msra.mxu0 %v1481_v10 }
  0xe7   : > { %v1463_v13 = vpop.permute.xlu0 %1462  ;;  %v1624_v14 = vpop.permute.xlu1 %1623 }
  0xe8   : > { %v1470_v15 = vsel %vm1464_vm8, %v1461_v8, %v1463_v13 }
  0xe9   : > { %1976 = vmatmul.mubr.msk.bf16.vlgmr.msra.gmra.mrb[40].mxu1 %vm293_vm2, %v1974_v11  ;;  %1978 = vmatmul.mubr.msk.bf16.vlgmr.msra.gmra.mrb[44].mxu0 %vm293_vm2, %v1974_v11 }
  0xea   : > { %1979 = vmatprep.subr.msk.bf16.mxu1 %vm297_vm1, %v1470_v15  ;;  %1606 = vmatprep.mubr.bf16.mxu1 %v2055_v6 }
  0xeb   : > { %1575 = vmatpush1.bf16.msra.mxu1 %v1487_v16  ;;  %v1626_v17 = vpop.permute.xlu0 %1625  ;;  %v1628_v18 = vpop.permute.xlu1 %1627  ;;  %1697 = vmatprep.mubr.bf16.mxu0 %v2055_v6 }
  0xec   : > { %v1638_v19 = vsel %vm1637_vm9, %v1624_v14, %v1626_v17  ;;  %v1639_v20 = vsel %vm1637_vm9, %v1626_v17, %v1628_v18 }
  0xed   : > { %v1648_v21 = vsel %vm297_vm1, %v1638_v19, 0  ;;  %1982 = vmatprep.subr.msk.bf16.mxu0 %vm297_vm1, %v1639_v20 }
  0xee   : > { %1666 = vmatpush1.bf16.msra.mxu0 %v1648_v21 }
  0xef   : > { %v1630_v23 = vpop.permute.xlu0 %1629  ;;  %v1632_v24 = vpop.permute.xlu1 %1631 }
  0xf0   : > { %v1640_v25 = vsel %vm1637_vm9, %v1628_v18, %v1630_v23  ;;  %v1641_v26 = vsel %vm1637_vm9, %v1630_v23, %v1632_v24 }
  0xf1   : > { %v1654_v27 = vsel %vm297_vm1, %v1640_v25, 0  ;;  %1980 = vmatmul.mubr.msk.bf16.vlgmr.msra.gmra.mrb[44].mxu1 %vm293_vm2, %v1974_v11  ;;  %1983 = vmatmul.mubr.msk.bf16.vlgmr.msra.gmra.mrb[48].mxu0 %vm293_vm2, %v1981_v22 }
  0xf2   : > { %1984 = vmatprep.subr.msk.bf16.mxu1 %vm297_vm1, %v1641_v26  ;;  %1738 = vmatprep.mubr.bf16.mxu1 %v2055_v6 }
  0xf3   : > { %1707 = vmatpush1.bf16.msra.mxu1 %v1654_v27  ;;  %v1634_v28 = vpop.permute.xlu0 %1633  ;;  %v1636_v29 = vpop.permute.xlu1 %1635  ;;  %1779 = vmatprep.mubr.bf16.mxu0 %v2055_v6 }
  0xf4   : > { %v1642_v30 = vsel %vm1637_vm9, %v1632_v24, %v1634_v28  ;;  %v1643_v31 = vsel %vm1637_vm9, %v1634_v28, %v1636_v29 }
  0xf5   : > { %v1660_v32 = vsel %vm297_vm1, %v1642_v30, 0  ;;  %1986 = vmatprep.subr.msk.bf16.mxu0 %vm297_vm1, %v1643_v31 }
  0xf6   : > { %1748 = vmatpush1.bf16.msra.mxu0 %v1660_v32 }
  0xf9   : > { %1985 = vmatmul.mubr.msk.bf16.vlgmr.msra.gmra.mrb[48].mxu1 %vm293_vm2, %v1981_v22  ;;  %1987 = vmatmul.mubr.msk.bf16.vlgmr.msra.gmra.mrb[52].mxu0 %vm293_vm2, %v1981_v22 }
 0x164   : > { %v350_v33 = vpop.f32.mrb[0].mxu0 }
 0x165   : > { %v352_v34 = vpop.f32.mrb[1].mxu0 }
 0x166   : > { %v354_v35 = vpop.f32.mrb[2].mxu0 }
 0x167   : > { %v355_v36 = vpop.f32.mrb[3].mxu0 }
 0x16c   : > { %v391_v37 = vpop.f32.mrb[0].mxu1  ;;  %v432_v38 = vpop.f32.mrb[4].mxu0 }
 0x16d   : > { %v393_v6 = vpop.f32.mrb[1].mxu1  ;;  %v434_v39 = vpop.f32.mrb[5].mxu0 }
 0x16e   : > { %v395_v40 = vpop.f32.mrb[2].mxu1  ;;  %v436_v41 = vpop.f32.mrb[6].mxu0 }
 0x16f   : > { %v396_v42 = vpop.f32.mrb[3].mxu1  ;;  %v437_v43 = vpop.f32.mrb[7].mxu0 }
 0x174   : > { %v494_v44 = vpop.f32.mrb[4].mxu1  ;;  %v535_v45 = vpop.f32.mrb[8].mxu0 }
 0x175   : > { %v495_v46 = vadd.f32 %v494_v44, %v350_v33  ;;  %v536_v47 = vadd.f32 %v535_v45, %v391_v37  ;;  %v496_v48 = vpop.f32.mrb[5].mxu1  ;;  %v537_v49 = vpop.f32.mrb[9].mxu0 }
 0x176   : > { %v497_v50 = vadd.f32 %v496_v48, %v352_v34  ;;  %v538_v51 = vadd.f32 %v537_v49, %v393_v6  ;;  %v498_v52 = vpop.f32.mrb[6].mxu1  ;;  %v539_v53 = vpop.f32.mrb[10].mxu0 }
 0x177   : > { %v499_v54 = vpop.f32.mrb[7].mxu1  ;;  %v540_v55 = vpop.f32.mrb[11].mxu0 }
 0x17c   : > { %v576_v56 = vpop.f32.mrb[8].mxu1  ;;  %v661_v57 = vpop.f32.mrb[12].mxu0 }
 0x17d   : > { %v577_v58 = vadd.f32 %v576_v56, %v432_v38  ;;  %v750_v59 = vadd.f32 %v661_v57, %v495_v46  ;;  %v578_v60 = vpop.f32.mrb[9].mxu1  ;;  %v663_v61 = vpop.f32.mrb[13].mxu0 }
 0x17e   : > { %v579_v62 = vadd.f32 %v578_v60, %v434_v39  ;;  %v751_v63 = vadd.f32 %v663_v61, %v497_v50  ;;  %v580_v0 = vpop.f32.mrb[10].mxu1  ;;  %v665_v1 = vpop.f32.mrb[14].mxu0 }
 0x17f   : > { %v581_v2 = vpop.f32.mrb[11].mxu1  ;;  %v666_v3 = vpop.f32.mrb[15].mxu0 }
 0x184   : > { %v702_v4 = vpop.f32.mrb[12].mxu1  ;;  %v743_v5 = vpop.f32.mrb[16].mxu0 }
 0x185   : > { %v752_v7 = vadd.f32 %v702_v4, %v536_v47  ;;  %v754_v8 = vadd.f32 %v743_v5, %v577_v58  ;;  %v704_v9 = vpop.f32.mrb[13].mxu1  ;;  %v745_v10 = vpop.f32.mrb[17].mxu0 }
 0x186   : > { %v753_v11 = vadd.f32 %v704_v9, %v538_v51  ;;  %v755_v12 = vadd.f32 %v745_v10, %v579_v62  ;;  %v706_v13 = vpop.f32.mrb[14].mxu1  ;;  %v747_v14 = vpop.f32.mrb[18].mxu0 }
 0x187   : > { %v707_v15 = vpop.f32.mrb[15].mxu1  ;;  %v748_v16 = vpop.f32.mrb[19].mxu0 }
 0x18c   : > { %v834_v17 = vpop.f32.mrb[16].mxu1  ;;  %v875_v18 = vpop.f32.mrb[20].mxu0 }
 0x18d   : > { %v923_v19 = vadd.f32 %v834_v17, %v750_v59  ;;  %v925_v20 = vadd.f32 %v875_v18, %v752_v7  ;;  %v836_v21 = vpop.f32.mrb[17].mxu1  ;;  %v877_v22 = vpop.f32.mrb[21].mxu0 }
 0x18e   : > { %v924_v23 = vadd.f32 %v836_v21, %v751_v63  ;;  %v926_v24 = vadd.f32 %v877_v22, %v753_v11  ;;  %v838_v25 = vpop.f32.mrb[18].mxu1  ;;  %v879_v26 = vpop.f32.mrb[22].mxu0 }
 0x18f   : > { %v839_v27 = vpop.f32.mrb[19].mxu1  ;;  %v880_v28 = vpop.f32.mrb[23].mxu0 }
 0x194   : > { %v916_v29 = vpop.f32.mrb[20].mxu1  ;;  %v1007_v30 = vpop.f32.mrb[24].mxu0 }
 0x195   : > { %v927_v31 = vadd.f32 %v916_v29, %v754_v8  ;;  %v1096_v32 = vadd.f32 %v1007_v30, %v923_v19  ;;  %v918_v33 = vpop.f32.mrb[21].mxu1  ;;  %v1009_v34 = vpop.f32.mrb[25].mxu0 }
 0x196   : > { %v928_v35 = vadd.f32 %v918_v33, %v755_v12  ;;  %v1097_v36 = vadd.f32 %v1009_v34, %v924_v23  ;;  %v920_v37 = vpop.f32.mrb[22].mxu1  ;;  %v1011_v38 = vpop.f32.mrb[26].mxu0 }
 0x197   : > { %v921_v6 = vpop.f32.mrb[23].mxu1  ;;  %v1012_v39 = vpop.f32.mrb[27].mxu0 }
 0x198   : > { %v1798_v37 = vpop.permute.xlu0 %1797 }
 0x19c   : > { %v1048_v40 = vpop.f32.mrb[24].mxu1  ;;  %v1089_v41 = vpop.f32.mrb[28].mxu0 }
 0x19d   : > { %v1098_v42 = vadd.f32 %v1048_v40, %v925_v20  ;;  %v1100_v43 = vadd.f32 %v1089_v41, %v927_v31  ;;  %v1050_v44 = vpop.f32.mrb[25].mxu1  ;;  %v1091_v45 = vpop.f32.mrb[29].mxu0 }
 0x19e   : > { %v1099_v46 = vadd.f32 %v1050_v44, %v926_v24  ;;  %v1101_v47 = vadd.f32 %v1091_v45, %v928_v35  ;;  %v1052_v48 = vpop.f32.mrb[26].mxu1  ;;  %v1093_v49 = vpop.f32.mrb[30].mxu0 }
 0x19f   : > { %v1053_v50 = vpop.f32.mrb[27].mxu1  ;;  %v1094_v51 = vpop.f32.mrb[31].mxu0 }
 0x1a4   : > { %v1180_v52 = vpop.f32.mrb[28].mxu1  ;;  %v1221_v53 = vpop.f32.mrb[32].mxu0 }
 0x1a5   : > { %v1269_v54 = vadd.f32 %v1180_v52, %v1096_v32  ;;  %v1271_v55 = vadd.f32 %v1221_v53, %v1098_v42  ;;  %v1182_v56 = vpop.f32.mrb[29].mxu1  ;;  %v1223_v57 = vpop.f32.mrb[33].mxu0 }
 0x1a6   : > { %v1270_v58 = vadd.f32 %v1182_v56, %v1097_v36  ;;  %v1272_v59 = vadd.f32 %v1223_v57, %v1099_v46  ;;  %v1184_v60 = vpop.f32.mrb[30].mxu1  ;;  %v1225_v61 = vpop.f32.mrb[34].mxu0 }
 0x1a7   : > { %v1185_v62 = vpop.f32.mrb[31].mxu1  ;;  %v1226_v63 = vpop.f32.mrb[35].mxu0 }
 0x1ac   : > { %v1262_v0 = vpop.f32.mrb[32].mxu1  ;;  %v1353_v1 = vpop.f32.mrb[36].mxu0 }
 0x1ad   : > { %v1273_v2 = vadd.f32 %v1262_v0, %v1100_v43  ;;  %v1442_v3 = vadd.f32 %v1353_v1, %v1269_v54  ;;  %v1264_v4 = vpop.f32.mrb[33].mxu1  ;;  %v1355_v5 = vpop.f32.mrb[37].mxu0 }
 0x1ae   : > { %v1274_v7 = vadd.f32 %v1264_v4, %v1101_v47  ;;  %v1443_v8 = vadd.f32 %v1355_v5, %v1270_v58  ;;  %v1266_v9 = vpop.f32.mrb[34].mxu1  ;;  %v1357_v10 = vpop.f32.mrb[38].mxu0 }
 0x1af   : > { %v1267_v11 = vpop.f32.mrb[35].mxu1  ;;  %v1358_v12 = vpop.f32.mrb[39].mxu0 }
 0x1b4   : > { %v1394_v13 = vpop.f32.mrb[36].mxu1  ;;  %v1435_v14 = vpop.f32.mrb[40].mxu0 }
 0x1b5   : > { %v1444_v15 = vadd.f32 %v1394_v13, %v1271_v55  ;;  %v1446_v16 = vadd.f32 %v1435_v14, %v1273_v2  ;;  %v1396_v17 = vpop.f32.mrb[37].mxu1  ;;  %v1437_v18 = vpop.f32.mrb[41].mxu0 }
 0x1b6   : > { %v1445_v19 = vadd.f32 %v1396_v17, %v1272_v59  ;;  %v1447_v20 = vadd.f32 %v1437_v18, %v1274_v7  ;;  %v1398_v21 = vpop.f32.mrb[38].mxu1  ;;  %v1439_v22 = vpop.f32.mrb[42].mxu0 }
 0x1b7   : > { %v1399_v23 = vpop.f32.mrb[39].mxu1  ;;  %v1440_v24 = vpop.f32.mrb[43].mxu0 }
 0x1bc   : > { %v1526_v25 = vpop.f32.mrb[40].mxu1  ;;  %v1567_v26 = vpop.f32.mrb[44].mxu0 }
 0x1bd   : > { %v1615_v27 = vadd.f32 %v1526_v25, %v1442_v3  ;;  %v1617_v28 = vadd.f32 %v1567_v26, %v1444_v15  ;;  %v1528_v29 = vpop.f32.mrb[41].mxu1  ;;  %v1569_v30 = vpop.f32.mrb[45].mxu0 }
 0x1be   : > { %v1616_v31 = vadd.f32 %v1528_v29, %v1443_v8  ;;  %v1618_v32 = vadd.f32 %v1569_v30, %v1445_v19  ;;  %v1530_v33 = vpop.f32.mrb[42].mxu1  ;;  %v1571_v34 = vpop.f32.mrb[46].mxu0 }
 0x1bf   : > { %v1531_v35 = vpop.f32.mrb[43].mxu1  ;;  %v1572_v36 = vpop.f32.mrb[47].mxu0 }
 0x1c4   : > { %v1608_v38 = vpop.f32.mrb[44].mxu1  ;;  %v1699_v6 = vpop.f32.mrb[48].mxu0 }
 0x1c5   : > { %v1619_v39 = vadd.f32 %v1608_v38, %v1446_v16  ;;  %v1788_v40 = vadd.f32 %v1699_v6, %v1615_v27  ;;  %v1610_v41 = vpop.f32.mrb[45].mxu1  ;;  %v1701_v42 = vpop.f32.mrb[49].mxu0 }
 0x1c6   : > { %v1620_v43 = vadd.f32 %v1610_v41, %v1447_v20  ;;  %v1789_v44 = vadd.f32 %v1701_v42, %v1616_v31  ;;  %v1612_v45 = vpop.f32.mrb[46].mxu1  ;;  %v1703_v46 = vpop.f32.mrb[50].mxu0 }
 0x1c7   : > { %v1800_v47 = vadd.f32 %v1798_v37, %v1788_v40  ;;  %v1613_v48 = vpop.f32.mrb[47].mxu1  ;;  %v1704_v49 = vpop.f32.mrb[51].mxu0 }
 0x1c8   : > { %v1801_v50 = vadd.f32 %v1798_v37, %v1789_v44 }
 0x1c9   : > { %1806 = vst [vmem:[%s229_s16] sm:$0xff] %v1800_v47 }
 0x1ca   : > { %1807 = vst [vmem:[%s229_s16 + $0x8] sm:$0xff] %v1801_v50 }
 0x1cc   : > { %v1740_v51 = vpop.f32.mrb[48].mxu1  ;;  %v1781_v52 = vpop.f32.mrb[52].mxu0 }
 0x1cd   : > { %v1790_v53 = vadd.f32 %v1740_v51, %v1617_v28  ;;  %v1792_v54 = vadd.f32 %v1781_v52, %v1619_v39  ;;  %v1742_v55 = vpop.f32.mrb[49].mxu1  ;;  %v1783_v56 = vpop.f32.mrb[53].mxu0 }
 0x1ce   : > { %v1791_v57 = vadd.f32 %v1742_v55, %v1618_v32  ;;  %v1793_v58 = vadd.f32 %v1783_v56, %v1620_v43  ;;  %v1744_v59 = vpop.f32.mrb[50].mxu1  ;;  %v1785_v60 = vpop.f32.mrb[54].mxu0 }
 0x1cf   : > { %v1802_v61 = vadd.f32 %v1798_v37, %v1790_v53  ;;  %v1804_v62 = vadd.f32 %v1798_v37, %v1792_v54  ;;  %v1745_v63 = vpop.f32.mrb[51].mxu1  ;;  %v1786_v0 = vpop.f32.mrb[55].mxu0 }
 0x1d0   : > { %v1803_v1 = vadd.f32 %v1798_v37, %v1791_v57  ;;  %v1805_v2 = vadd.f32 %v1798_v37, %v1793_v58 }
 0x1d1   : > { %1808 = vst [vmem:[%s229_s16 + $0x10] sm:$0xff] %v1802_v61  ;;  %1810 = vst [vmem:[%s229_s16 + $0x20] sm:$0xff] %v1804_v62 }
 0x1d2   : > { %1809 = vst [vmem:[%s229_s16 + $0x18] sm:$0xff] %v1803_v1  ;;  %1811 = vst [vmem:[%s229_s16 + $0x28] sm:$0xff] %v1805_v2 }
 0x1d3 PF: > { %s13_s14 = sadd.s32 1, %s2052_s14   ;;  %s2373_s12 = smov %s2048_s13 }
 0x1d4   : > { %p10_p5 = scmp.ge.s32.totalorder %s13_s14, 5   ;;  %s2374_s13 = smov %s2376_s15 }
 0x1d6   :  { %12 = sbr.rel (!%p10_p5) target bundleno = 2 (0x2), region = 76 }

</bundles_post_ra>
